<compile_context>
chip_gen: v5e
topology: v5e:2x2
jax: 0.10.0
libtpu: 0.0.40
codegen_flags: <defaults>
</compile_context>

<pallas_src>
import jax
import jax.numpy as jnp
from jax.experimental import pallas as pl
from jax.experimental.pallas import tpu as pltpu


def _gumbel_map_kernel(seed_ref, base_ref, o_ref):
    """o[b, f] = base[0, f] + U[0, 1)  (float32), noise from a stateless hash."""
    j = pl.program_id(0)          # feature-tile index (outer grid axis)
    i = pl.program_id(1)          # batch-tile index   (inner grid axis)
    bb, bf = o_ref.shape

    # Global (row, col) element coordinates of this tile.
    rows = jax.lax.broadcasted_iota(jnp.int32, (bb, bf), 0) + i * bb
    cols = jax.lax.broadcasted_iota(jnp.int32, (bb, bf), 1) + j * bf

    # Stateless counter-based PRNG: mix (row, col, seed) and run a lowbias32
    # style finalizer.  Only 32-bit int mul/xor/shift + int->float convert,
    # so it lowers on TPU hardware *and* in interpret mode.
    x = (rows.astype(jnp.uint32) * jnp.uint32(0x9E3779B1)) \
        ^ (cols.astype(jnp.uint32) * jnp.uint32(0x85EBCA77)) \
        ^ seed_ref[0].astype(jnp.uint32)
    x = x ^ (x >> 16)
    x = x * jnp.uint32(0x7FEB352D)
    x = x ^ (x >> 15)
    x = x * jnp.uint32(0x846CA68B)
    x = x ^ (x >> 16)
    # Top 24 bits -> uniform [0, 1) with exact float32 integers.
    u = (x >> 8).astype(jnp.int32).astype(jnp.float32) * jnp.float32(1.0 / (1 << 24))

    # base_ref is (1, bf): broadcasts over the batch sublanes.
    o_ref[...] = base_ref[...] + u


def get_gumbel_map(batch_size: int, grid_size: int, seed: int = 0):
    """Pallas equivalent of the PyTorch get_gumbel_map module's forward."""
    G = 2 * grid_size + 1
    N = G * G
    F = 2 * N                                  # lane-dense flattened (N, 2)

    # Deterministic integer base map (tiny; constant-folded by XLA).
    k = jnp.arange(N, dtype=jnp.int32)
    col = (k % G) - grid_size                  # channel 0 ("x2")
    row = (k // G) - grid_size                 # channel 1 ("x1")
    base = jnp.stack([col, row], axis=-1).reshape(1, F).astype(jnp.float32)

    B = int(batch_size)
    # F is 2*odd^2 -> never a 128-multiple: use the full extent when small,
    # otherwise a fixed 128-aligned tile and let Pallas mask the partial block.
    block_f = F if F <= 2048 else 2048
    # Large batch tiles (~4 MiB output tile at 512x2048xf32) to amortize the
    # ~0.35 us per grid step and saturate HBM writeback on all generations.
    block_b = B if B <= 512 else 512
    # Feature-tile axis outermost, batch-tile innermost: the (1, block_f) base
    # block index is then constant across consecutive steps (no re-DMA).
    grid = (pl.cdiv(F, block_f), pl.cdiv(B, block_b))

    seed_arr = jnp.asarray([seed], dtype=jnp.int32)

    out2d = pl.pallas_call(
        _gumbel_map_kernel,
        out_shape=jax.ShapeDtypeStruct((B, F), jnp.float32),
        grid_spec=pltpu.PrefetchScalarGridSpec(
            num_scalar_prefetch=1,
            grid=grid,
            in_specs=[pl.BlockSpec((1, block_f), lambda j, i, seed_ref: (0, j))],
            out_specs=pl.BlockSpec(
                (block_b, block_f), lambda j, i, seed_ref: (i, j)
            ),
        ),
        compiler_params=pltpu.CompilerParams(
            # No accumulator / revisit -> both axes parallel (lets v7x shard
            # the writeback across its 2 TensorCores; no-op on v5e/v6e).
            dimension_semantics=("parallel", "parallel"),
            vmem_limit_bytes=32 * 1024 * 1024,
        ),
        cost_estimate=pl.CostEstimate(
            flops=12 * B * F,
            transcendentals=0,
            bytes_accessed=B * F * 4 + F * 4,
        ),
    )(seed_arr, base)

    # Free (view-style) reshape back to the PyTorch layout (B, (2g+1)^2, 2).
    return out2d.reshape(B, N, 2)


if __name__ == "__main__":
    grid_size = 7            # G = 15  -> 225 grid points
    batch_size = 2

    key = jax.random.PRNGKey(0)
    seed = int(jax.random.randint(key, (), 0, 2**31 - 1, dtype=jnp.int32))

    y = get_gumbel_map(batch_size, grid_size, seed=seed)
    y = jax.block_until_ready(y)

    G = 2 * grid_size + 1
    N = G * G
    assert y.shape == (batch_size, N, 2) and y.dtype == jnp.float32

    # Reference base map, built exactly the way the PyTorch module builds it.
    x = jnp.arange(0, G, dtype=jnp.int32)[:, None]
    X = jnp.tile(x, (1, G))
    x1 = X - grid_size
    x2 = x1.T
    ref_base = jnp.concatenate([x2[..., None], x1[..., None]], axis=2)
    ref_base = ref_base.reshape(1, N, 2).astype(jnp.float32)
    ref_base = jnp.broadcast_to(ref_base, y.shape)

    frac = y - ref_base
    # Deterministic part matches and added noise is uniform in [0, 1)
    # (<= 1.0 tolerates the rare float32 round-up at base + (1 - 2^-24)).
    assert bool(jnp.all((frac >= 0.0) & (frac <= 1.0)))
    assert 0.3 < float(jnp.mean(frac)) < 0.7
    assert bool(jnp.any(y[0] != y[1]))   # per-batch noise differs
    print("KERNEL_OK")
</pallas_src>

<mosaic_0001>
module attributes {stable_mosaic.version = 11 : i64} {
  func.func @_gumbel_map_kernel(%arg0: i32, %arg1: i32, %arg2: memref<1xi32, #tpu.memory_space<smem>>, %arg3: memref<1x450xf32, #tpu.memory_space<vmem>>, %arg4: memref<2x450xf32, #tpu.memory_space<vmem>>) attributes {dimension_semantics = [#tpu.dimension_semantics<parallel>, #tpu.dimension_semantics<parallel>], iteration_bounds = array<i64: 1, 1>, scalar_prefetch = 1 : i64, scratch_operands = 0 : i64, tpu.core_type = #tpu.core_type<tc>, window_params = [{transform_indices = @transform_0, window_bounds = array<i64: 1, 450>}, {transform_indices = @transform_1, window_bounds = array<i64: 2, 450>}]} {
    %0 = tpu.iota {dimensions = array<i32: 0>} : vector<2x450xi32>
    %c2_i32 = arith.constant 2 : i32
    %1 = arith.muli %arg1, %c2_i32 : i32
    %2 = vector.broadcast %1 : i32 to vector<2x450xi32>
    %3 = arith.addi %0, %2 : vector<2x450xi32>
    %4 = tpu.iota {dimensions = array<i32: 1>} : vector<2x450xi32>
    %c450_i32 = arith.constant 450 : i32
    %5 = arith.muli %arg0, %c450_i32 : i32
    %6 = vector.broadcast %5 : i32 to vector<2x450xi32>
    %7 = arith.addi %4, %6 : vector<2x450xi32>
    %c-1640531535_i32 = arith.constant -1640531535 : i32
    %8 = vector.broadcast %c-1640531535_i32 : i32 to vector<2x450xi32>
    %9 = arith.muli %3, %8 : vector<2x450xi32>
    %c-2048144777_i32 = arith.constant -2048144777 : i32
    %10 = vector.broadcast %c-2048144777_i32 : i32 to vector<2x450xi32>
    %11 = arith.muli %7, %10 : vector<2x450xi32>
    %12 = arith.xori %9, %11 : vector<2x450xi32>
    %c0 = arith.constant 0 : index
    %13 = memref.load %arg2[%c0] : memref<1xi32, #tpu.memory_space<smem>>
    %14 = vector.broadcast %13 : i32 to vector<2x450xi32>
    %15 = arith.xori %12, %14 : vector<2x450xi32>
    %c16_i32 = arith.constant 16 : i32
    %16 = vector.broadcast %c16_i32 : i32 to vector<2x450xi32>
    %17 = arith.shrui %15, %16 : vector<2x450xi32>
    %18 = arith.xori %15, %17 : vector<2x450xi32>
    %c2146121005_i32 = arith.constant 2146121005 : i32
    %19 = vector.broadcast %c2146121005_i32 : i32 to vector<2x450xi32>
    %20 = arith.muli %18, %19 : vector<2x450xi32>
    %c15_i32 = arith.constant 15 : i32
    %21 = vector.broadcast %c15_i32 : i32 to vector<2x450xi32>
    %22 = arith.shrui %20, %21 : vector<2x450xi32>
    %23 = arith.xori %20, %22 : vector<2x450xi32>
    %c-2073254261_i32 = arith.constant -2073254261 : i32
    %24 = vector.broadcast %c-2073254261_i32 : i32 to vector<2x450xi32>
    %25 = arith.muli %23, %24 : vector<2x450xi32>
    %c16_i32_0 = arith.constant 16 : i32
    %26 = vector.broadcast %c16_i32_0 : i32 to vector<2x450xi32>
    %27 = arith.shrui %25, %26 : vector<2x450xi32>
    %28 = arith.xori %25, %27 : vector<2x450xi32>
    %c8_i32 = arith.constant 8 : i32
    %29 = vector.broadcast %c8_i32 : i32 to vector<2x450xi32>
    %30 = arith.shrui %28, %29 : vector<2x450xi32>
    %31 = arith.sitofp %30 : vector<2x450xi32> to vector<2x450xf32>
    %cst = arith.constant 5.96046448E-8 : f32
    %32 = vector.broadcast %cst : f32 to vector<2x450xf32>
    %33 = arith.mulf %31, %32 : vector<2x450xf32>
    %c0_1 = arith.constant 0 : index
    %c0_2 = arith.constant 0 : index
    %34 = vector.load %arg3[%c0_1, %c0_2] : memref<1x450xf32, #tpu.memory_space<vmem>>, vector<1x450xf32>
    %35 = vector.broadcast %34 : vector<1x450xf32> to vector<2x450xf32>
    %36 = arith.addf %35, %33 : vector<2x450xf32>
    %c0_3 = arith.constant 0 : index
    %c0_4 = arith.constant 0 : index
    %37 = vector.load %arg4[%c0_3, %c0_4] : memref<2x450xf32, #tpu.memory_space<vmem>>, vector<2x450xf32>
    tpu.vector_store %arg4[%c0_3, %c0_4], %36 {strides = array<i32>} : memref<2x450xf32, #tpu.memory_space<vmem>>, vector<2x450xf32>,
    return
  }
  func.func @transform_0(%arg0: i32, %arg1: i32, %arg2: memref<1xi32, #tpu.memory_space<smem>>) -> (i32, i32) {
    %c0_i32 = arith.constant 0 : i32
    %c0_i32_0 = arith.constant 0 : i32
    return %c0_i32, %arg0 : i32, i32
  }
  func.func @transform_1(%arg0: i32, %arg1: i32, %arg2: memref<1xi32, #tpu.memory_space<smem>>) -> (i32, i32) {
    %c0_i32 = arith.constant 0 : i32
    return %arg1, %arg0 : i32, i32
  }
}

</mosaic_0001>

<bundles_post_ra>
// kernel: tpu_custom_call.1
= control target key start
LH: loop header
LB: loop body
LE: loop exit
PB: predicated region body
PF: predicated region fallthrough
CT: control target
= control target key end

     0   :  { %8 = vsyncpa [#allocation5], 0  ;;  %s235_s0 = inlined_call_operand.<no memory space> [shape: s32[1], index: 0, kind: input, shape index: {}]   ;;  %s236_s1 = inlined_call_operand.hbm [shape: f32[1,450], index: 1, kind: input, shape index: {}]   ;;  %s237_s2 = inlined_call_operand.hbm [shape: f32[2,450], index: 2, kind: output, shape index: {}]  }
   0x1   :  { %9 = vsyncpa [#allocation6], 0  ;;  %s15_s11 = sshll.u32 %s236_s1, 4  ;;  %s205_s12 = smov [#allocation4]   ;;  %s16_s11 = int_to_ptr.hbm [resolvable:$true] %s15_s11 }
   0x2   :  { %s17_s13 = sshll.u32 %s205_s12, 4  ;;  %s18_s13 = int_to_ptr.vmem [resolvable:$true] %s17_s13 }
   0x3   :  { %20 = dma.hbm_to_vmem [thread:$0]  %s16_s11, 64, %s18_s13, [#allocation5]  }
   0x4   :  { %201 = dma.done.wait [#allocation5], 64  }
   0x5   :  { %202 = vsyncadd [#allocation5], 4294967232  ;;  %v25_v0 = vlaneseq  ;;  %v51_v12 = vstv %s235_s0  ;;  %v100_v52 = vld [vmem:[#allocation4] sm:$0xf]  ;;  %vm121_vm0 = vcmask 1041408   ;;  %vm128_vm1 = vcmask 1043458  }
   0x6   :  { %v102_v58 = vperm.slane %v100_v52, 0  ;;  %v103_v59 = vperm.slane %v100_v52, 1  ;;  %v104_v60 = vperm.slane %v100_v52, 2  ;;  %vm123_vm2 = vcmask 1045508   ;;  %vm129_vm3 = vmor %vm128_vm1, %vm121_vm0  ;;  %s206_s0 = smov [#allocation7]   ;;  %s141_s18 = sshll.u32 %s237_s2, 4  ;;  %s142_s18 = int_to_ptr.hbm [resolvable:$true] %s141_s18 }
   0x7   :  { %v26_v1 = vshrl.u32 %v25_v0, 7  ;;  %v31_v2 = vand.u32 127, %v25_v0  ;;  %v105_v0 = vperm.slane %v100_v52, 3  ;;  %vm131_vm4 = vcmask 539654   ;;  %vm130_vm5 = vmor %vm123_vm2, %vm129_vm3  ;;  %s139_s15 = sshll.u32 %s206_s0, 4  ;;  %s140_s15 = int_to_ptr.vmem [resolvable:$true] %s139_s15 }
   0x8   :  { %vm125_vm6 = vcmask 1043456   ;;  %vm132_vm7 = vmor %vm131_vm4, %vm130_vm5 }
   0x9   :  { %v32_v3 = vadd.s32 128, %v31_v2  ;;  %v33_v4 = vadd.s32 256, %v31_v2  ;;  %v34_v5 = vadd.s32 384, %v31_v2  ;;  %v41_v6 = vmul.u32 2654435761, %v26_v1 }
   0xa   :  { %v42_v7 = vmul.u32 2246822519, %v31_v2 }
   0xb   :  { %v43_v8 = vmul.u32 2246822519, %v32_v3  ;;  %v44_v9 = vmul.u32 2246822519, %v33_v4  ;;  %v45_v10 = vmul.u32 2246822519, %v34_v5 }
   0xc   :  { %v46_v11 = vxor.u32 %v42_v7, %v41_v6 }
   0xd   :  { %v47_v13 = vxor.u32 %v43_v8, %v41_v6  ;;  %v48_v14 = vxor.u32 %v44_v9, %v41_v6  ;;  %v49_v15 = vxor.u32 %v45_v10, %v41_v6 }
   0xe   :  { %v52_v16 = vxor.u32 %v51_v12, %v46_v11 }
   0xf   :  { %v53_v17 = vxor.u32 %v51_v12, %v47_v13  ;;  %v54_v18 = vxor.u32 %v51_v12, %v48_v14  ;;  %v55_v19 = vxor.u32 %v51_v12, %v49_v15 }
  0x10   :  { %v56_v20 = vshrl.u32 %v52_v16, 16 }
  0x11   :  { %v57_v21 = vshrl.u32 %v53_v17, 16  ;;  %v58_v22 = vshrl.u32 %v54_v18, 16  ;;  %v59_v23 = vshrl.u32 %v55_v19, 16 }
  0x12   :  { %v60_v24 = vxor.u32 %v56_v20, %v52_v16 }
  0x13   :  { %v61_v25 = vxor.u32 %v57_v21, %v53_v17  ;;  %v62_v26 = vxor.u32 %v58_v22, %v54_v18  ;;  %v63_v27 = vxor.u32 %v59_v23, %v55_v19 }
  0x14   :  { %v64_v28 = vmul.u32 2146121005, %v60_v24 }
  0x15   :  { %v65_v29 = vmul.u32 2146121005, %v61_v25  ;;  %v66_v30 = vmul.u32 2146121005, %v62_v26  ;;  %v67_v31 = vmul.u32 2146121005, %v63_v27 }
  0x16   :  { %v68_v32 = vshrl.u32 %v64_v28, 15 }
  0x17   :  { %v69_v33 = vshrl.u32 %v65_v29, 15  ;;  %v70_v34 = vshrl.u32 %v66_v30, 15  ;;  %v71_v35 = vshrl.u32 %v67_v31, 15 }
  0x18   :  { %v72_v36 = vxor.u32 %v68_v32, %v64_v28 }
  0x19   :  { %v73_v37 = vxor.u32 %v69_v33, %v65_v29  ;;  %v74_v38 = vxor.u32 %v70_v34, %v66_v30  ;;  %v75_v39 = vxor.u32 %v71_v35, %v67_v31 }
  0x1a   :  { %v76_v40 = vmul.u32 2221713035, %v72_v36 }
  0x1b   :  { %v77_v41 = vmul.u32 2221713035, %v73_v37  ;;  %v78_v42 = vmul.u32 2221713035, %v74_v38  ;;  %v79_v43 = vmul.u32 2221713035, %v75_v39 }
  0x1c   :  { %v80_v44 = vshrl.u32 %v76_v40, 16 }
  0x1d   :  { %v81_v45 = vshrl.u32 %v77_v41, 16  ;;  %v82_v46 = vshrl.u32 %v78_v42, 16  ;;  %v83_v47 = vshrl.u32 %v79_v43, 16 }
  0x1e   :  { %v84_v48 = vxor.u32 %v80_v44, %v76_v40 }
  0x1f   :  { %v85_v49 = vxor.u32 %v81_v45, %v77_v41  ;;  %v86_v50 = vxor.u32 %v82_v46, %v78_v42  ;;  %v87_v51 = vxor.u32 %v83_v47, %v79_v43 }
  0x20   :  { %v88_v53 = vshrl.u32 %v84_v48, 8 }
  0x21   :  { %v89_v54 = vshrl.u32 %v85_v49, 8  ;;  %v90_v55 = vshrl.u32 %v86_v50, 8  ;;  %v91_v56 = vshrl.u32 %v87_v51, 8 }
  0x22   :  { %v92_v57 = vcvt.s32.f32 %v88_v53 }
  0x23   :  { %v93_v61 = vcvt.s32.f32 %v89_v54  ;;  %v94_v62 = vcvt.s32.f32 %v90_v55  ;;  %v95_v63 = vcvt.s32.f32 %v91_v56 }
  0x24   :  { %v96_v1 = vmul.f32 5.9604645e-08, %v92_v57 }
  0x25   :  { %v97_v2 = vmul.f32 5.9604645e-08, %v93_v61  ;;  %v98_v3 = vmul.f32 5.9604645e-08, %v94_v62  ;;  %v99_v4 = vmul.f32 5.9604645e-08, %v95_v63 }
  0x26   :  { %v110_v5 = vadd.f32 %v102_v58, %v96_v1 }
  0x27   :  { %v111_v6 = vadd.f32 %v103_v59, %v97_v2  ;;  %v112_v7 = vadd.f32 %v104_v60, %v98_v3  ;;  %v113_v8 = vadd.f32 %v105_v0, %v99_v4 }
  0x29   :  { %v118_v9 = vrot.slane %v111_v6, 6  ;;  %v119_v10 = vrot.slane %v112_v7, 4  ;;  %v120_v11 = vrot.slane %v113_v8, 2 }
  0x2b   :  { %v122_v12 = vsel %vm121_vm0, %v110_v5, %v118_v9  ;;  %v124_v13 = vsel %vm123_vm2, %v119_v10, %v120_v11 }
  0x2c   :  { %v126_v14 = vsel %vm125_vm6, %v122_v12, %v124_v13 }
  0x2d   :  { %133 = vst.msk [vmem:[#allocation7] sm:$0xff] %vm132_vm7, %v126_v14 }
  0x2e   :  { %144 = dma.vmem_to_hbm [thread:$0]  %s140_s15, 128, %s142_s18, [#allocation6]  }
  0x2f   :  { %203 = dma.done.wait [#allocation6], 128  }
  0x30   :  { %204 = vsyncadd [#allocation6], 4294967168 }
  0x31   :  { %149 = vsyncpa [#allocation5], 1 }
  0x32   :  { %150 = vsyncpa [#allocation6], 1 }

</bundles_post_ra>
